<compile_context>
chip_gen: v5e
topology: v5e:2x2
jax: 0.10.0
libtpu: 0.0.40
codegen_flags: <defaults>
</compile_context>

<pallas_src>
import jax
import jax.numpy as jnp
from jax.experimental import pallas as pl
from jax.experimental.pallas import tpu as pltpu


def _copy_kernel(x_ref, o_ref):
    # Pure passthrough: full-tile load -> store. HBM-bandwidth bound.
    o_ref[...] = x_ref[...]


def _sublane_min(dtype):
    # Minimum second-to-last-dim granularity: 8 for 4-byte, 16 for 2-byte,
    # 32 for 1-byte dtypes.
    itemsize = jnp.dtype(dtype).itemsize
    return max(8, 32 // max(1, itemsize))


def _vmem_budget():
    """(tile_bytes, vmem_limit_bytes), sized per TPU generation."""
    try:
        phys = pltpu.get_tpu_info().vmem_capacity_bytes
    except Exception:  # conservative fallback (assume v7x-like 64 MiB)
        phys = 64 << 20
    if phys >= (128 << 20):        # v5e / v6e: 128 MiB physical VMEM
        return 8 << 20, 64 << 20
    # v7x: 64 MiB physical — 4 pipelined 8 MiB buffers = 32 MiB <= 48 MiB cap.
    return 8 << 20, 48 << 20


def _as_2d(x):
    """Lane-dense 2-D view without any padding (pure metadata reshape)."""
    total = x.size
    if total % 128 == 0:
        # Prefer a large lane count that still leaves >= 8 rows for tiling.
        for lanes in (4096, 2048, 1024, 512, 256, 128):
            if total % lanes == 0 and total // lanes >= 8:
                return x.reshape(total // lanes, lanes)
        for lanes in (4096, 2048, 1024, 512, 256, 128):
            if total % lanes == 0:
                return x.reshape(total // lanes, lanes)
    if x.ndim >= 2:
        last = x.shape[-1]
        return x.reshape(total // last, last)  # full-extent last-dim block
    return x.reshape(1, total)


def _pallas_copy(x):
    """Physically distinct copy of x via a tiled, pipelined Pallas kernel."""
    dtype = x.dtype
    x2d = _as_2d(x)
    rows, lanes = x2d.shape
    sub = _sublane_min(dtype)
    itemsize = jnp.dtype(dtype).itemsize
    tile_bytes, vmem_limit = _vmem_budget()

    # ~8 MiB row tiles, rounded down to the dtype sublane granularity.
    tile_r = max(sub, (tile_bytes // (lanes * itemsize)) // sub * sub)
    if tile_r >= rows:
        if rows >= 2 * sub:
            # Force >= 2 grid steps so "parallel" shards across v7x's 2 TCs.
            tile_r = ((pl.cdiv(rows, 2) + sub - 1) // sub) * sub
        else:
            tile_r = rows  # tiny input: full-extent block (always legal)
    grid = (pl.cdiv(rows, tile_r),)

    out2d = pl.pallas_call(
        _copy_kernel,
        out_shape=jax.ShapeDtypeStruct((rows, lanes), dtype),
        grid=grid,
        in_specs=[pl.BlockSpec((tile_r, lanes), lambda i: (i, 0))],
        out_specs=pl.BlockSpec((tile_r, lanes), lambda i: (i, 0)),
        compiler_params=pltpu.CompilerParams(
            dimension_semantics=("parallel",),
            vmem_limit_bytes=vmem_limit,
        ),
    )(x2d)
    return out2d.reshape(x.shape)


def shared_global_encoder(x, *, force_copy=False):
    """Forward pass of Shared_Global_Encoder (identity; see TODO above).

    Args:
        x: jnp.ndarray of shape (N, C, H, W), any dtype.
        force_copy: if True, materialize a physically distinct output buffer
            via the Pallas copy kernel; otherwise return the input as-is
            (fastest possible identity — zero HBM traffic).
    Returns:
        jnp.ndarray of the same shape/dtype as x.
    """
    if not force_copy or x.size == 0:
        return x
    return _pallas_copy(x)


if __name__ == "__main__":
    key = jax.random.PRNGKey(0)
    # Small NCHW input consistent with the (conv-style) module convention.
    x = jax.random.normal(key, (2, 4, 16, 16), dtype=jnp.float32)

    # Fast path (identity elision).
    y_fast = shared_global_encoder(x)
    jax.block_until_ready(y_fast)
    assert y_fast.shape == x.shape and y_fast.dtype == x.dtype

    # Kernel path (physical copy through the Pallas kernel).
    y = shared_global_encoder(x, force_copy=True)
    jax.block_until_ready(y)

    assert y.shape == x.shape and y.dtype == x.dtype
    assert bool(jnp.allclose(y, x))
    assert bool(jnp.allclose(y_fast, x))

    print("KERNEL_OK")
</pallas_src>

<mosaic_0001>
module attributes {stable_mosaic.version = 11 : i64} {
  func.func @_copy_kernel(%arg0: i32, %arg1: memref<8x256xf32, #tpu.memory_space<vmem>>, %arg2: memref<8x256xf32, #tpu.memory_space<vmem>>) attributes {dimension_semantics = [#tpu.dimension_semantics<parallel>], iteration_bounds = array<i64: 1>, scalar_prefetch = 0 : i64, scratch_operands = 0 : i64, tpu.core_type = #tpu.core_type<tc>, window_params = [{transform_indices = @transform_0, window_bounds = array<i64: 8, 256>}, {transform_indices = @transform_1, window_bounds = array<i64: 8, 256>}]} {
    %c0 = arith.constant 0 : index
    %c0_0 = arith.constant 0 : index
    %0 = vector.load %arg1[%c0, %c0_0] : memref<8x256xf32, #tpu.memory_space<vmem>>, vector<8x256xf32>
    %c0_1 = arith.constant 0 : index
    %c0_2 = arith.constant 0 : index
    %1 = vector.load %arg2[%c0_1, %c0_2] : memref<8x256xf32, #tpu.memory_space<vmem>>, vector<8x256xf32>
    tpu.vector_store %arg2[%c0_1, %c0_2], %0 {strides = array<i32>} : memref<8x256xf32, #tpu.memory_space<vmem>>, vector<8x256xf32>,
    return
  }
  func.func @transform_0(%arg0: i32) -> (i32, i32) {
    %c0_i32 = arith.constant 0 : i32
    %c0_i32_0 = arith.constant 0 : i32
    return %arg0, %c0_i32 : i32, i32
  }
  func.func @transform_1(%arg0: i32) -> (i32, i32) {
    %c0_i32 = arith.constant 0 : i32
    %c0_i32_0 = arith.constant 0 : i32
    return %arg0, %c0_i32 : i32, i32
  }
}

</mosaic_0001>

<bundles_post_ra>
// kernel: tpu_custom_call.1
= control target key start
LH: loop header
LB: loop body
LE: loop exit
PB: predicated region body
PF: predicated region fallthrough
CT: control target
= control target key end

     0   :  { %6 = vsyncpa [#allocation3], 0  ;;  %s116_s0 = inlined_call_operand.hbm [shape: f32[8,256], index: 0, kind: input, shape index: {}]   ;;  %s117_s1 = inlined_call_operand.hbm [shape: f32[8,256], index: 1, kind: output, shape index: {}]  }
   0x1   :  { %7 = vsyncpa [#allocation4], 0  ;;  %s13_s8 = sshll.u32 %s116_s0, 4  ;;  %s98_s9 = smov [#allocation2]   ;;  %s14_s8 = int_to_ptr.hbm [resolvable:$true] %s13_s8 }
   0x2   :  { %s15_s10 = sshll.u32 %s98_s9, 4  ;;  %s16_s10 = int_to_ptr.vmem [resolvable:$true] %s15_s10 }
   0x3   :  { %18 = dma.hbm_to_vmem [thread:$0]  %s14_s8, 256, %s16_s10, [#allocation3]  }
   0x4   :  { %94 = dma.done.wait [#allocation3], 256  }
   0x5   :  { %95 = vsyncadd [#allocation3], 4294967040  ;;  %s99_s11 = smov [#allocation5]   ;;  %s34_s15 = sshll.u32 %s117_s1, 4  ;;  %v23_v0 = vld [vmem:[#allocation2] sm:$0xff]  ;;  %v24_v1 = vld [vmem:[#allocation2 + $0x8] sm:$0xff]  ;;  %s35_s15 = int_to_ptr.hbm [resolvable:$true] %s34_s15 }
   0x6   :  { %s32_s12 = sshll.u32 %s99_s11, 4  ;;  %25 = vst [vmem:[#allocation5] sm:$0xff] %v23_v0  ;;  %s33_s12 = int_to_ptr.vmem [resolvable:$true] %s32_s12 }
   0x7   :  { %26 = vst [vmem:[#allocation5 + $0x8] sm:$0xff] %v24_v1 }
   0x8   :  { %37 = dma.vmem_to_hbm [thread:$0]  %s33_s12, 256, %s35_s15, [#allocation4]  }
   0x9   :  { %96 = dma.done.wait [#allocation4], 256  }
   0xa   :  { %97 = vsyncadd [#allocation4], 4294967040 }
   0xb   :  { %42 = vsyncpa [#allocation3], 1 }
   0xc   :  { %43 = vsyncpa [#allocation4], 1 }

</bundles_post_ra>
